<compile_context>
chip_gen: v7x
topology: tpu7x:2x2x1
jax: 0.10.0
libtpu: 0.0.40
codegen_flags: <defaults>
</compile_context>

<pallas_src>
import functools

import jax
import jax.numpy as jnp
from jax.experimental import pallas as pl
from jax.experimental.pallas import tpu as pltpu

_EPS = 1e-12                 # torch.nn.functional.normalize default eps
_EPS2 = _EPS * _EPS
_LANES = 128
_SUBLANES = 8
_MAX_BLOCK = 32768           # samples per grid step (256 sublanes x 128 lanes)
_PALLAS_MIN_BATCH = 512      # below this, use the pure-JAX fallback
_N_CORES = 2                 # megacore split on v7x; harmless on v5e/v6e


def _round_up(x, m):
    return ((x + m - 1) // m) * m


def _loss_math(o, t, v):
    """Pure-JAX mirror of the PyTorch module (torch eps semantics)."""
    o = o.astype(jnp.float32)
    t = t.astype(jnp.float32)
    v = v.astype(jnp.float32)
    o_n = o / jnp.maximum(jnp.linalg.norm(o, axis=1, keepdims=True), _EPS)
    t_n = t / jnp.maximum(jnp.linalg.norm(t, axis=1, keepdims=True), _EPS)
    dist = jnp.linalg.norm(o_n - t_n, axis=1)
    return jnp.mean(v + jnp.exp(-v) * dist)


def _aleotoric_loss_kernel(slab_ref, out_ref, *, k):
    t = pl.program_id(1)

    @pl.when(t == 0)
    def _():
        out_ref[...] = jnp.zeros_like(out_ref)

    x = slab_ref[...].astype(jnp.float32)          # (2k+1, S, 128)
    o = x[0:k]                                     # (k, S, 128)
    tv = x[k:2 * k]                                # (k, S, 128)
    v = x[2 * k]                                   # (S, 128)

    # Dense VPU adds over the tiny K axis (no cross-lane work).
    o_sq = jnp.sum(o * o, axis=0)                  # (S, 128)
    t_sq = jnp.sum(tv * tv, axis=0)
    dot = jnp.sum(o * tv, axis=0)

    # F.normalize(o)·F.normalize(t) via one fused rsqrt (EUP);
    # ||o_n - t_n|| = sqrt(max(2 - 2*cos, 0)) for unit vectors.
    inv = jax.lax.rsqrt(jnp.maximum(o_sq, _EPS2) * jnp.maximum(t_sq, _EPS2))
    cos = dot * inv
    dist = jnp.sqrt(jnp.maximum(2.0 - 2.0 * cos, 0.0))

    # var + exp(-var) * dist; padded samples were constructed to contribute 0.
    per_sample = v + jnp.exp(-v) * dist            # (S, 128)

    # Resident per-core f32 partial-sum block; cross-lane reduce deferred to wrapper.
    out_ref[...] += per_sample[None]


def aleotoric_loss(output_vector, target_vector, var_o, mode="cartesian",
                   *, force_pallas=False):
    """Pallas implementation of AleotoricLoss.forward (mode='cartesian')."""
    if mode != "cartesian":
        # TODO(synk): 'spherical' mode needs cartesial2spherical, which is not
        # defined in the reference source; only 'cartesian' is implemented.
        raise NotImplementedError("only mode='cartesian' is implemented")

    B, K = output_vector.shape

    if B < _PALLAS_MIN_BATCH and not force_pallas:
        # Tiny batches: launch + layout plumbing dwarfs ~200 bytes of data.
        return _loss_math(output_vector, target_vector, jnp.reshape(var_o, (B,)))

    # ---- tiling: batch on (sublane, lane), split across (cores, tiles) -------
    lanes_per_block = _SUBLANES * _LANES                        # 1024 minimum
    per_core = pl.cdiv(B, _N_CORES)
    block_n = min(_MAX_BLOCK, _round_up(per_core, lanes_per_block))
    tiles_per_core = pl.cdiv(B, _N_CORES * block_n)
    total_tiles = _N_CORES * tiles_per_core
    b_pad = total_tiles * block_n
    s = block_n // _LANES                                       # multiple of 8

    # ---- single stacked slab (one wrapper copy, one DMA stream per step) -----
    dtype = jnp.result_type(output_vector.dtype, target_vector.dtype, var_o.dtype)
    rows = 2 * K + 1
    o_t = jnp.transpose(output_vector.astype(dtype))            # (K, B)
    t_t = jnp.transpose(target_vector.astype(dtype))            # (K, B)
    v_t = jnp.reshape(var_o.astype(dtype), (1, B))              # (1, B)
    slab = jnp.concatenate([o_t, t_t, v_t], axis=0)             # (rows, B)
    pad_w = b_pad - B
    if pad_w:
        # Pad o/t with the unit vector e0 and var with 0 so padded samples
        # contribute exactly 0 to the sum (kernel needs no mask).
        pad = jnp.zeros((rows, pad_w), dtype)
        pad = pad.at[0, :].set(1).at[K, :].set(1)
        slab = jnp.concatenate([slab, pad], axis=1)
    slab = jnp.reshape(slab, (rows, total_tiles, s, _LANES))

    kernel = functools.partial(_aleotoric_loss_kernel, k=K)
    in_bytes = slab.size * slab.dtype.itemsize
    out_bytes = _N_CORES * s * _LANES * 4

    partials = pl.pallas_call(
        kernel,
        out_shape=jax.ShapeDtypeStruct((_N_CORES, s, _LANES), jnp.float32),
        grid_spec=pltpu.PrefetchScalarGridSpec(
            num_scalar_prefetch=0,
            grid=(_N_CORES, tiles_per_core),
            in_specs=[
                pl.BlockSpec(
                    (rows, None, s, _LANES),
                    lambda c, t: (0, c * tiles_per_core + t, 0, 0),
                ),
            ],
            out_specs=pl.BlockSpec((1, s, _LANES), lambda c, t: (c, 0, 0)),
        ),
        compiler_params=pltpu.CompilerParams(
            # axis 0: per-core partial sums (megacore); axis 1: reduction loop.
            dimension_semantics=("parallel", "arbitrary"),
        ),
        cost_estimate=pl.CostEstimate(
            flops=int(b_pad * (6 * K + 10)),
            transcendentals=int(3 * b_pad),
            bytes_accessed=int(in_bytes + out_bytes),
        ),
    )(slab)

    return jnp.sum(partials) / B


if __name__ == "__main__":
    key = jax.random.PRNGKey(0)
    k1, k2, k3, k4, k5, k6 = jax.random.split(key, 6)

    # Small production-like shape (batch of 8 gaze vectors, 3-D cartesian).
    # Force the Pallas path so the kernel itself is exercised at the small shape.
    B, K = 8, 3
    out_v = jax.random.normal(k1, (B, K), dtype=jnp.float32)
    tgt_v = jax.random.normal(k2, (B, K), dtype=jnp.float32)
    var_o = jax.random.normal(k3, (B,), dtype=jnp.float32)

    loss = jax.block_until_ready(
        aleotoric_loss(out_v, tgt_v, var_o, force_pallas=True))
    ref = _loss_math(out_v, tgt_v, var_o)
    assert jnp.allclose(loss, ref, rtol=1e-5, atol=1e-5), (loss, ref)

    # Auto-dispatch for tiny batches uses the pure-JAX fallback; same result.
    loss_fb = jax.block_until_ready(aleotoric_loss(out_v, tgt_v, var_o))
    assert jnp.allclose(loss_fb, ref, rtol=1e-5, atol=1e-5), (loss_fb, ref)

    # Larger, non-aligned batch in bf16: multi-tile grid, dual-core partial
    # sums, zero-contribution padding lanes, in-kernel bf16 -> f32 cast.
    B2 = 2500
    out2 = jax.random.normal(k4, (B2, K), dtype=jnp.float32).astype(jnp.bfloat16)
    tgt2 = jax.random.normal(k5, (B2, K), dtype=jnp.float32).astype(jnp.bfloat16)
    var2 = jax.random.normal(k6, (B2,), dtype=jnp.float32).astype(jnp.bfloat16)

    loss2 = jax.block_until_ready(aleotoric_loss(out2, tgt2, var2))
    ref2 = _loss_math(out2, tgt2, var2)
    assert jnp.allclose(loss2, ref2, rtol=1e-4, atol=1e-4), (loss2, ref2)

    print("KERNEL_OK")
</pallas_src>

<mosaic_0001>
module attributes {stable_mosaic.version = 11 : i64} {
  func.func @_aleotoric_loss_kernel(%arg0: i32, %arg1: i32, %arg2: memref<7x1x8x128xf32, #tpu.memory_space<vmem>>, %arg3: memref<1x8x128xf32, #tpu.memory_space<vmem>>) attributes {dimension_semantics = [#tpu.dimension_semantics<parallel>, #tpu.dimension_semantics<arbitrary>], iteration_bounds = array<i64: 2, 1>, scalar_prefetch = 0 : i64, scratch_operands = 0 : i64, tpu.core_type = #tpu.core_type<tc>, window_params = [{transform_indices = @transform_0, window_bounds = array<i64: 7, 1, 8, 128>}, {transform_indices = @transform_1, window_bounds = array<i64: 1, 8, 128>}]} {
    %c0_i32 = arith.constant 0 : i32
    %0 = arith.cmpi eq, %arg1, %c0_i32 : i32
    %1 = arith.extui %0 : i1 to i32
    %c0_i32_0 = arith.constant 0 : i32
    %2 = arith.cmpi ne, %1, %c0_i32_0 : i32
    scf.if %2 {
      %cst_18 = arith.constant 0.000000e+00 : f32
      %38 = vector.broadcast %cst_18 : f32 to vector<1x8x128xf32>
      %c0_19 = arith.constant 0 : index
      %c0_20 = arith.constant 0 : index
      %c0_21 = arith.constant 0 : index
      %39 = vector.load %arg3[%c0_19, %c0_20, %c0_21] : memref<1x8x128xf32, #tpu.memory_space<vmem>>, vector<1x8x128xf32>
      tpu.vector_store %arg3[%c0_19, %c0_20, %c0_21], %38 {strides = array<i32>} : memref<1x8x128xf32, #tpu.memory_space<vmem>>, vector<1x8x128xf32>,
    } else {
    }
    %c0 = arith.constant 0 : index
    %c0_1 = arith.constant 0 : index
    %c0_2 = arith.constant 0 : index
    %c0_3 = arith.constant 0 : index
    %3 = vector.load %arg2[%c0, %c0_1, %c0_2, %c0_3] : memref<7x1x8x128xf32, #tpu.memory_space<vmem>>, vector<7x1x8x128xf32>
    %4 = vector.shape_cast %3 : vector<7x1x8x128xf32> to vector<7x8x128xf32>
    %5 = vector.extract_strided_slice %4 {offsets = [0, 0, 0], sizes = [3, 8, 128], strides = [1, 1, 1]} : vector<7x8x128xf32> to vector<3x8x128xf32>
    %6 = vector.extract_strided_slice %4 {offsets = [3, 0, 0], sizes = [3, 8, 128], strides = [1, 1, 1]} : vector<7x8x128xf32> to vector<3x8x128xf32>
    %7 = vector.extract_strided_slice %4 {offsets = [6, 0, 0], sizes = [1, 8, 128], strides = [1, 1, 1]} : vector<7x8x128xf32> to vector<1x8x128xf32>
    %8 = vector.shape_cast %7 : vector<1x8x128xf32> to vector<8x128xf32>
    %9 = arith.mulf %5, %5 : vector<3x8x128xf32>
    %cst = arith.constant dense<0.000000e+00> : vector<8x128xf32>
    %10 = vector.multi_reduction <add>, %9, %cst [0] : vector<3x8x128xf32> to vector<8x128xf32>
    %11 = arith.mulf %6, %6 : vector<3x8x128xf32>
    %cst_4 = arith.constant dense<0.000000e+00> : vector<8x128xf32>
    %12 = vector.multi_reduction <add>, %11, %cst_4 [0] : vector<3x8x128xf32> to vector<8x128xf32>
    %13 = arith.mulf %5, %6 : vector<3x8x128xf32>
    %cst_5 = arith.constant dense<0.000000e+00> : vector<8x128xf32>
    %14 = vector.multi_reduction <add>, %13, %cst_5 [0] : vector<3x8x128xf32> to vector<8x128xf32>
    %cst_6 = arith.constant 1.000000e-24 : f32
    %15 = vector.broadcast %cst_6 : f32 to vector<8x128xf32>
    %16 = arith.maximumf %10, %15 : vector<8x128xf32>
    %cst_7 = arith.constant 1.000000e-24 : f32
    %17 = vector.broadcast %cst_7 : f32 to vector<8x128xf32>
    %18 = arith.maximumf %12, %17 : vector<8x128xf32>
    %19 = arith.mulf %16, %18 : vector<8x128xf32>
    %20 = math.rsqrt %19 : vector<8x128xf32>
    %21 = arith.mulf %14, %20 : vector<8x128xf32>
    %cst_8 = arith.constant 2.000000e+00 : f32
    %22 = vector.broadcast %cst_8 : f32 to vector<8x128xf32>
    %23 = arith.mulf %22, %21 : vector<8x128xf32>
    %cst_9 = arith.constant 2.000000e+00 : f32
    %24 = vector.broadcast %cst_9 : f32 to vector<8x128xf32>
    %25 = arith.subf %24, %23 : vector<8x128xf32>
    %cst_10 = arith.constant 0.000000e+00 : f32
    %26 = vector.broadcast %cst_10 : f32 to vector<8x128xf32>
    %27 = arith.maximumf %25, %26 : vector<8x128xf32>
    %28 = math.sqrt %27 : vector<8x128xf32>
    %cst_11 = arith.constant 0.000000e+00 : f32
    %29 = vector.broadcast %cst_11 : f32 to vector<8x128xf32>
    %30 = arith.subf %29, %8 : vector<8x128xf32>
    %31 = math.exp %30 : vector<8x128xf32>
    %32 = arith.mulf %31, %28 : vector<8x128xf32>
    %33 = arith.addf %8, %32 : vector<8x128xf32>
    %c0_12 = arith.constant 0 : index
    %c0_13 = arith.constant 0 : index
    %c0_14 = arith.constant 0 : index
    %34 = vector.load %arg3[%c0_12, %c0_13, %c0_14] : memref<1x8x128xf32, #tpu.memory_space<vmem>>, vector<1x8x128xf32>
    %35 = vector.shape_cast %33 : vector<8x128xf32> to vector<1x8x128xf32>
    %36 = arith.addf %34, %35 : vector<1x8x128xf32>
    %c0_15 = arith.constant 0 : index
    %c0_16 = arith.constant 0 : index
    %c0_17 = arith.constant 0 : index
    %37 = vector.load %arg3[%c0_15, %c0_16, %c0_17] : memref<1x8x128xf32, #tpu.memory_space<vmem>>, vector<1x8x128xf32>
    tpu.vector_store %arg3[%c0_15, %c0_16, %c0_17], %36 {strides = array<i32>} : memref<1x8x128xf32, #tpu.memory_space<vmem>>, vector<1x8x128xf32>,
    return
  }
  func.func @transform_0(%arg0: i32, %arg1: i32) -> (i32, i32, i32, i32) {
    %c1_i32 = arith.constant 1 : i32
    %0 = arith.muli %arg0, %c1_i32 : i32
    %1 = arith.addi %0, %arg1 : i32
    %c0_i32 = arith.constant 0 : i32
    %c0_i32_0 = arith.constant 0 : i32
    %c0_i32_1 = arith.constant 0 : i32
    %c0_i32_2 = arith.constant 0 : i32
    return %c0_i32, %1, %c0_i32_0, %c0_i32_1 : i32, i32, i32, i32
  }
  func.func @transform_1(%arg0: i32, %arg1: i32) -> (i32, i32, i32) {
    %c0_i32 = arith.constant 0 : i32
    %c0_i32_0 = arith.constant 0 : i32
    %c0_i32_1 = arith.constant 0 : i32
    return %arg0, %c0_i32, %c0_i32_0 : i32, i32, i32
  }
}

</mosaic_0001>

<bundles_post_ra>
// kernel: tpu_custom_call.1
= control target key start
LH: loop header
LB: loop body
LE: loop exit
PB: predicated region body
PF: predicated region fallthrough
CT: control target
= control target key end

     0   :  { %6 = vsyncpa [#allocation3], 0  ;;  %s679_s0 = inlined_call_operand.hbm [shape: f32[7,2,8,128], index: 0, kind: input, shape index: {}]   ;;  %s680_s1 = inlined_call_operand.hbm [shape: f32[2,8,128], index: 1, kind: output, shape index: {}]  }
   0x1   :  { %8 = vsyncpa [#allocation3 + $0x1], 0 }
   0x2   :  { %9 = vsyncpa [#allocation4], 0 }
   0x3   :  { %11 = vsyncpa [#allocation4 + $0x1], 0  ;;  %s507_s6 = smov 0   ;;  %s509_s7 = smov 0  }
   0x4   :  { %s511_s8 = smov 0   ;;  %s513_s9 = smov 0  }
   0x5   :  { %s515_s10 = smov 0   ;;  %s517_s11 = smov 0  }
   0x6 LB: > { %s293_s12 = sadd.s32 4294967295, %s490_s11   ;;  %s294_s13 = sadd.s32 4294967294, %s490_s11   ;;  %s490_s11 = sphi %s517_s11, %s17_s11   ;;  %s486_s10 = sphi %s515_s10, %s694_s10   ;;  %s482_s9 = sphi %s513_s9, %s693_s9   ;;  %s478_s8 = sphi %s511_s8, %s692_s8   ;;  %s474_s7 = sphi %s509_s7, %s691_s7   ;;  %s470_s6 = sphi %s507_s6, %s690_s6  }
   0x7   : > { %s29_s14 = sadd.s32 1, %s486_s10  ;;  %s38_s15 = sadd.s32 1, %s478_s8 }
   0x8   : > { %p31_p0 = scmp.ge.s32.totalorder %s29_s14, 2  ;;  %p45_p1 = scmp.ne.s32.totalorder %s478_s8, %s474_s7 }
   0x9   : > { %p46_p2 = scmp.eq.s32.totalorder %s490_s11, 0  ;;  %p51_p3 = scmp.ne.s32.totalorder %s474_s7, %s470_s6 }
   0xa   : > { %s696_s14 = smov (%p31_p0, %s29_s14), 0  ;;  %p52_p5 = scmp.eq.s32.totalorder %s293_s12, 0 }
   0xb   : > { %p548_p4 = por %p46_p2, %p45_p1  ;;  %s35_s17 = ssub.s32 %s486_s10, %s696_s14 }
   0xc   : > { %p75_p6 = scmp.eq.s32.totalorder %s293_s12, 1  ;;  %p36_p7 = scmp.eq.s32.totalorder %s35_s17, 0 }
   0xd   : > { %p554_p8 = por %p52_p5, %p51_p3  ;;  %p81_p10 = scmp.eq.s32.totalorder %s294_s13, 1 }
   0xe   : > { %p558_p9 = por %p75_p6, %p45_p1  ;;  %p318_p13 = scmp.lt.s32.totalorder %s490_s11, 2 }
   0xf   : > { %s563_s20 = scalar_select %p36_p7, %s478_s8, %s38_s15  }
  0x10   : > { %s684_s19 = scalar_select %p558_p9, 1, 0 }
  0x11   : > { %p565_p11 = por %p81_p10, %p51_p3  ;;  %s101_s22 = sand.u32 1, %s478_s8  }
  0x12   : > { %s304_s23 = smul.u32 56, %s101_s22  ;;  %s297_s24 = sshll.u32 %s486_s10, 7 }
  0x13   : > { %s685_s21 = scalar_select %p565_p11, 1, 0 }
  0x14   : > { %p575_p0 = pnand %p318_p13, %p548_p4  ;;  %s582_s28 = scalar_lea.hbm %s679_s0, %s297_s24 }
  0x15   : > { %s105_s29 = scalar_lea.vmem [#allocation2], %s304_s23  ;;  %s586_s2 = scalar_lea.sflag [#allocation3], %s101_s22 }
  0x16   : > { %s112_s30 = sshll.u32 %s105_s29, 4  ;;  %s378_s3 = scalar_lea.hbm %s582_s28, 896  ;;  %s584_s30 = int_to_ptr.vmem [resolvable:$true] %s112_s30 }
  0x17   : > { %p379_p1 = scmp.ne.s32.totalorder %s582_s28, %s378_s3  ;;  %p380_p2 = pneg %p575_p0 }
  0x18   : > { %s383_s12 = scalar_lea.hbm %s679_s0, 1792  ;;  %p384_p5 = scmp.lt.u32.totalorder %s582_s28, %s679_s0 }
  0x19   : > { %p381_p3 = pnand %p380_p2, %p379_p1  ;;  %p385_p6 = scmp.lt.u32.totalorder %s383_s12, %s378_s3 }
  0x1a   : > { %p387_p10 = scmp.lt.u32.totalorder %s378_s3, %s582_s28 }
  0x1b   : > { %p382_p4 = pneg %p381_p3  ;;  %p386_p7 = por %p385_p6, %p384_p5 }
  0x1d   : > { %p388_p13 = por %p387_p10, %p386_p7 }
  0x1f   : > { %p389_p12 = pnand %p388_p13, %p382_p4 }
  0x21   : > { %392 = shalt.err (!%p389_p12)
}
  0x22   : > { %s393_s16 = scalar_lea.vmem %s584_s30, 896  ;;  %s492_s17 = smov [#allocation2]  }
  0x23   : > { %p394_p1 = scmp.ne.s32.totalorder %s584_s30, %s393_s16  ;;  %s398_s22 = sshll.u32 %s492_s17, 4  ;;  %s399_s22 = int_to_ptr.vmem [resolvable:$false] %s398_s22 }
  0x24   : > { %s400_s23 = scalar_lea.vmem %s399_s22, 1792  ;;  %p401_p9 = scmp.lt.s32.totalorder %s584_s30, %s399_s22 }
  0x25   : > { %p396_p3 = pnand %p394_p1, %p380_p2  ;;  %p402_p5 = scmp.lt.s32.totalorder %s400_s23, %s393_s16 }
  0x27   : > { %p397_p11 = pneg %p396_p3  ;;  %p403_p6 = por %p402_p5, %p401_p9 }
  0x29   : > { %p404_p7 = pnand %p403_p6, %p397_p11 }
  0x2b   : > { %407 = shalt.err (!%p404_p7)
}
  0x2c   : > { %s493_s24 = smov 256   ;;  %s494_s26 = smov 128  }
  0x2d   : > { %s495_s27 = smov 8   ;;  %p298_p12 = scmp.ge.s32.totalorder %s490_s11, 1 }
  0x2e   : > { %313 = dma.hbm_to_vmem [thread:$0]  (!%p575_p0), %s582_s28, 896, %s584_s30, %s586_s2, %s493_s24, %s494_s26, %s495_s27  }
  0x2f   : > { %p120_p2 = scmp.lt.s32.totalorder %s490_s11, 3 }
  0x31   : > { %p121_p4 = pnand %p298_p12, %p120_p2 }
  0x32   : > { %s617_s29 = sand.u32 (!%p121_p4), 1, %s474_s7  }
  0x33   : > { %124 = sbr.rel (%p121_p4) target bundleno = 123 (0x7b), region = 24  ;;  %s127_s4 = scalar_lea.sflag (!%p121_p4), [#allocation3], %s617_s29 }
  0x34   : > { %s305_s3 = smul.u32 (!%p121_p4), 56, %s617_s29 }
  0x36   : > { %s130_s5 = scalar_lea.vmem (!%p121_p4), [#allocation2], %s305_s3 }
  0x3a   : > { %461 = dma.done.wait (%p554_p8), %s127_s4, 896  }
  0x3b   : > { %463 = vsyncadd (%p554_p8), %s127_s4, 4294966400  ;;  %v155_v0 = vld [vmem:[%s130_s5] sm:$0xff]  ;;  %v156_v1 = vld [vmem:[%s130_s5 + $0x8] sm:$0xff]  ;;  %s299_s18 = sshll.u32 %s617_s29, 3  ;;  %s301_s25 = sshll.u32 %s482_s9, 7 }
  0x3c   : > { %v157_v2 = vld [vmem:[%s130_s5 + $0x10] sm:$0xff]  ;;  %v158_v3 = vld [vmem:[%s130_s5 + $0x18] sm:$0xff]  ;;  %v159_v4 = vld [vmem:[%s130_s5 + $0x20] sm:$0xff]  ;;  %v162_v6 = vmul.f32 %v155_v0, %v155_v0  ;;  %v163_v7 = vmul.f32 %v156_v1, %v156_v1  ;;  %s148_s28 = scalar_lea.vmem [#allocation5], %s299_s18  ;;  %s630_s13 = scalar_lea.hbm %s680_s1, %s301_s25 }
  0x3d   : > { %v160_v5 = vld [vmem:[%s130_s5 + $0x28] sm:$0xff]  ;;  %v164_v8 = vmul.f32 %v157_v2, %v157_v2  ;;  %v167_v9 = vmul.f32 %v158_v3, %v158_v3  ;;  %v168_v10 = vmul.f32 %v159_v4, %v159_v4  ;;  %v172_v19 = vmul.f32 %v158_v3, %v155_v0  ;;  %v161_v25 = vld [vmem:[%s130_s5 + $0x30] sm:$0xff]  ;;  %s214_s30 = sshll.u32 %s148_s28, 4  ;;  %s201_s15 = scalar_lea.sflag [#allocation4], %s617_s29  ;;  %s632_s30 = int_to_ptr.vmem [resolvable:$true] %s214_s30 }
  0x3e   : > { %v169_v11 = vmul.f32 %v160_v5, %v160_v5  ;;  %v165_v12 = vadd.f32 %v163_v7, %v162_v6  ;;  %v173_v20 = vmul.f32 %v159_v4, %v156_v1  ;;  %v174_v21 = vmul.f32 %v160_v5, %v157_v2  ;;  %s408_s16 = scalar_lea.vmem %s632_s30, 128  ;;  %p687_p9 = scmp.ne.s32.totalorder %s684_s19, 0 }
  0x3f   : > { %v170_v13 = vadd.f32 %v168_v10, %v167_v9  ;;  %v192_v28 = vsub.f32 0.0, %v161_v25  ;;  %p409_p8 = scmp.ne.s32.totalorder %s632_s30, %s408_s16  ;;  %s496_s9 = smov [#allocation5]  }
  0x40   : > { %v166_v14 = vadd.f32 %v165_v12, %v164_v8  ;;  %v175_v22 = vadd.f32 %v173_v20, %v172_v19  ;;  %s412_s17 = sshll.u32 %s496_s9, 4  ;;  %s413_s17 = int_to_ptr.vmem [resolvable:$false] %s412_s17 }
  0x41   : > { %v171_v15 = vadd.f32 %v170_v13, %v169_v11  ;;  %v193_v31 = vmul.f32 1.442695, %v192_v28  ;;  %p410_p11 = pnand %p409_p8, %p687_p9  ;;  %s414_s22 = scalar_lea.vmem %s413_s17, 256 }
  0x42   : > { %v177_v16 = vmax.f32 %v166_v14, 1e-24  ;;  %v176_v23 = vadd.f32 %v175_v22, %v174_v21  ;;  %p415_p10 = scmp.lt.s32.totalorder %s632_s30, %s413_s17  ;;  %p416_p13 = scmp.lt.s32.totalorder %s414_s22, %s408_s16 }
  0x43   : > { %v178_v17 = vmax.f32 %v171_v15, 1e-24  ;;  %p411_p0 = pneg %p410_p11 }
  0x44   : > { %p417_p1 = por %p416_p13, %p415_p10 }
  0x45   : > { %v179_v18 = vmul.f32 %v178_v17, %v177_v16 }
  0x46   : > { %p418_p3 = pnand %p417_p1, %p411_p0 }
  0x47   : > { %372 = vrsqrt.f32 %v179_v18 }
  0x51   : > { %v373_v24 = vpop.eup %372 }
  0x52   : > { %v181_v26 = vmul.f32 %v373_v24, %v176_v23 }
  0x54   : > { %v182_v27 = vmul.f32 2.0, %v181_v26 }
  0x56   : > { %v183_v29 = vsub.f32 2.0, %v182_v27 }
  0x58   : > { %v184_v30 = vmax.f32 %v183_v29, 0.0 }
  0x5a   : > { %374 = vrsqrt.f32 %v184_v30  ;;  %vm187_vm0 = vcmp.eq.f32.partialorder %v184_v30, inf  ;;  %v190_v33 = vand.u32 2147483648, %v184_v30  ;;  %vm189_vm1 = vcmp.eq.f32.partialorder %v184_v30, 0.0 }
  0x5b   : > { %376 = vpow2.f32 %v193_v31 }
  0x64   : > { %v375_v32 = vpop.eup %374 }
  0x65   : > { %v186_v34 = vmul.f32 %v375_v32, %v184_v30  ;;  %v377_v35 = vpop.eup %376 }
  0x67   : > { %v188_v36 = vsel %vm187_vm0, %v184_v30, %v186_v34 }
  0x68   : > { %v191_v37 = vsel %vm189_vm1, %v190_v33, %v188_v36 }
  0x69   : > { %v195_v38 = vmul.f32 %v377_v35, %v191_v37 }
  0x6b   : > { %v196_v39 = vadd.f32 %v195_v38, %v161_v25 }
  0x6d   : > { %199 = vst [vmem:[%s148_s28] sm:$0xff] %v196_v39 }
  0x6e   : > { %421 = shalt.err (!%p418_p3)
}
  0x6f   : > { %s422_s23 = scalar_lea.hbm %s630_s13, 128  ;;  %s426_s27 = scalar_lea.hbm %s680_s1, 256 }
  0x70   : > { %p423_p5 = scmp.ne.s32.totalorder %s630_s13, %s422_s23  ;;  %p427_p12 = scmp.lt.u32.totalorder %s630_s13, %s680_s1 }
  0x71   : > { %p428_p2 = scmp.lt.u32.totalorder %s426_s27, %s422_s23  ;;  %p430_p8 = scmp.lt.u32.totalorder %s422_s23, %s630_s13 }
  0x72   : > { %p424_p6 = pnand %p423_p5, %p687_p9 }
  0x73   : > { %p429_p4 = por %p428_p2, %p427_p12 }
  0x74   : > { %p425_p7 = pneg %p424_p6 }
  0x75   : > { %p431_p11 = por %p430_p8, %p429_p4 }
  0x77   : > { %p432_p0 = pnand %p431_p11, %p425_p7 }
  0x79   : > { %435 = shalt.err (!%p432_p0)
}
  0x7a   : > { %308 = dma.vmem_to_hbm [thread:$0]  (%p687_p9), %s632_s30, 128, %s630_s13, %s201_s15  }
  0x7b PF: > { %s226_s4 = sand.u32 1, %s470_s6   ;;  %p688_p10 = scmp.ne.s32.totalorder %s685_s21, 0 }
  0x7c   : > { %p689_p13 = scmp.ge.s32.totalorder %s490_s11, 2  ;;  %s227_s5 = scalar_lea.sflag [#allocation4], %s226_s4 }
  0x7e   : > { %p315_p1 = pnand %p689_p13, %p688_p10 }
  0x80   : > { %465 = dma.done.wait (!%p315_p1), %s227_s5, 128  }
  0x81   : > { %467 = vsyncadd (!%p315_p1), %s227_s5, 4294967168  ;;  %s17_s11 = sadd.s32 1, %s490_s11   ;;  %s690_s6 = smov %s474_s7 }
  0x82   : > { %p14_p3 = scmp.ge.s32.totalorder %s17_s11, 4   ;;  %s691_s7 = smov %s478_s8 }
  0x83   : > { %s692_s8 = smov %s563_s20  ;;  %s693_s9 = smov %s486_s10 }
  0x84   : > { %s694_s10 = smov %s696_s14  ;;  %16 = sbr.rel (!%p14_p3) target bundleno = 6 (0x6), region = 73 }
  0x8b   :  { %232 = vsyncpa [#allocation3], 1 }
  0x8c   :  { %234 = vsyncpa [#allocation3 + $0x1], 1 }
  0x8d   :  { %235 = vsyncpa [#allocation4], 1 }
  0x8e   :  { %237 = vsyncpa [#allocation4 + $0x1], 1 }

</bundles_post_ra>
